<compile_context>
chip_gen: v7x
topology: tpu7x:2x2x1
jax: 0.10.0
libtpu: 0.0.40
codegen_flags: <defaults>
</compile_context>

<pallas_src>
import functools

import jax
import jax.numpy as jnp
from jax.experimental import pallas as pl
from jax.experimental.pallas import tpu as pltpu

_LANE = 128  # lane quantum (last dim)


def _round_up(x, m):
    return (x + m - 1) // m * m


def _vmem_capacity_bytes():
    try:
        return int(pltpu.get_tpu_info().vmem_capacity_bytes)
    except Exception:
        return 64 << 20  # most conservative (v7x per-TC VMEM)


def _delay_kernel(x_ref, o_ref, carry_ref, *, offset, volume_factor):
    """out = x + volume_factor * shift_right(stream, offset) for one (r, tb) block."""
    x = x_ref[...]                                   # (r, tb)
    vf = jnp.asarray(volume_factor, x.dtype)

    if offset == 0:                                  # static: no shift at all
        o_ref[...] = x + vf * x
        return

    j = pl.program_id(1)                             # time-block index (sequential)

    @pl.when(j == 0)
    def _zero_carry():
        # Zeros represent stream positions < 0 => the t < offset zero prefix.
        carry_ref[...] = jnp.zeros_like(carry_ref)

    tb = x.shape[1]
    co = carry_ref.shape[1]                          # round_up(offset, 128) >= offset

    # Window over the last (co + tb) stream samples ending at this block's end.
    # The leading operand width (co) is 128-aligned, so the lane concat is cheap.
    w = jnp.concatenate([carry_ref[...], x], axis=1)  # (r, co + tb)

    # delayed[l] = stream[block_start + l - offset].  Static (possibly lane-
    # misaligned) slice; Mosaic lowers it to lane rotates/selects.  pltpu.roll is
    # avoided on purpose so the shift direction stays unambiguous -- the op is
    # HBM-bound, so this relayout hides under the DMA anyway.
    delayed = w[:, co - offset: co - offset + tb]
    o_ref[...] = x + vf * delayed

    # Rolling carry: last `co` samples of the stream seen so far.
    carry_ref[...] = w[:, tb: tb + co]


@functools.lru_cache(maxsize=None)
def _build_delay_call(n, t, dtype_str, offset, volume_factor, time_block):
    """Build (and cache) the pallas_call for a given (shape, dtype, offset)."""
    dtype = jnp.dtype(dtype_str)
    itemsize = dtype.itemsize
    sub = max(8, 32 // itemsize)                      # dtype-aware sublane quantum
    co = max(_LANE, _round_up(offset, _LANE))         # carry width (lanes)

    vmem_cap = _vmem_capacity_bytes()
    # v5e/v6e have 128 MiB VMEM per TC -> bigger blocks; v7x has 64 MiB.
    target = (6 << 20) if vmem_cap >= (96 << 20) else (4 << 20)

    # --- time block: lane-dense (long contiguous DMA rows, unmasked stores). ---
    if time_block is not None:
        tb = min(t, _round_up(max(int(time_block), 1), _LANE))
    else:
        row_min = n if n <= sub else sub
        tb_max = max(_LANE, (target // (row_min * itemsize)) // _LANE * _LANE)
        tb = t if t <= tb_max else tb_max              # full dim, or multiple of 128

    # --- row block: multiple of `sub`, sized so one block ~= target bytes. ---
    if n <= sub:
        r = n
    else:
        max_r = max(sub, (target // (tb * itemsize)) // sub * sub)
        r = min(max_r, (n // sub) * sub)
        # Megacore (v7x has 2 TCs): keep at least two row blocks when possible.
        if r >= n and n >= 2 * sub:
            r = _round_up((n + 1) // 2, sub)

    grid = (pl.cdiv(n, r), pl.cdiv(t, tb))             # time axis last (carry order)

    # Scoped-VMEM budget: double-buffered in + out blocks, the (r, co+tb) window
    # temp, the carry scratch, plus slack.
    block_bytes = r * tb * itemsize
    carry_bytes = r * co * itemsize
    needed = 6 * block_bytes + 3 * carry_bytes + (2 << 20)
    vmem_limit = min(int(vmem_cap * 3 // 4), max(needed, 32 << 20))

    kernel = functools.partial(
        _delay_kernel, offset=offset, volume_factor=volume_factor)

    return pl.pallas_call(
        kernel,
        out_shape=jax.ShapeDtypeStruct((n, t), dtype),
        grid=grid,
        in_specs=[pl.BlockSpec((r, tb), lambda i, j: (i, j))],
        out_specs=pl.BlockSpec((r, tb), lambda i, j: (i, j)),
        scratch_shapes=[pltpu.VMEM((r, co), dtype)],
        compiler_params=pltpu.CompilerParams(
            dimension_semantics=("parallel", "arbitrary"),
            vmem_limit_bytes=vmem_limit),
        cost_estimate=pl.CostEstimate(
            flops=2 * n * t, transcendentals=0,
            bytes_accessed=2 * n * t * itemsize),
    )


def delay_forward(audio, offset, volume_factor, *, time_block=None):
    orig_shape = audio.shape
    T = orig_shape[-1]
    offset = int(offset)
    if not 0 <= offset <= T:
        raise ValueError(f"delay offset {offset} must be in [0, {T}]")
    x2d = audio.reshape(-1, T)
    n = x2d.shape[0]
    call = _build_delay_call(n, T, str(x2d.dtype), offset, float(volume_factor),
                             time_block)
    return call(x2d).reshape(orig_shape)


class Delay:
    """JAX/Pallas port of torchaudio_augmentations Delay (forward only)."""

    def __init__(self, sample_rate, volume_factor=0.5):
        self.sample_rate = sample_rate
        self.volume_factor = volume_factor

    def calc_offset(self, ms):
        return int(ms * (self.sample_rate / 1000))

    def __call__(self, audio, ms, *, time_block=None):
        return delay_forward(audio, self.calc_offset(ms), self.volume_factor,
                             time_block=time_block)


def _reference(audio, offset, volume_factor):
    beginning = jnp.zeros(audio.shape[:-1] + (offset,), dtype=audio.dtype)
    end = audio[..., : audio.shape[-1] - offset]
    delayed = jnp.concatenate((beginning, end), axis=-1) * jnp.asarray(
        volume_factor, audio.dtype)
    return audio + delayed


if __name__ == "__main__":
    key = jax.random.PRNGKey(0)
    sample_rate = 16000
    delay = Delay(sample_rate=sample_rate, volume_factor=0.5)

    def check(audio, ms, **kw):
        out = jax.block_until_ready(delay(audio, ms, **kw))
        ref = _reference(audio, delay.calc_offset(ms), delay.volume_factor)
        assert out.shape == audio.shape and out.dtype == audio.dtype
        tol = 1e-6 if audio.dtype == jnp.float32 else 2e-2
        assert jnp.allclose(out, ref, atol=tol, rtol=tol), (audio.shape, ms, kw)

    k0, k1, k2, k3, k4, k5 = jax.random.split(key, 6)

    # 1) basic single-block case: offset=48, T=1024.
    check(jax.random.normal(k0, (2, 4, 1024), dtype=jnp.float32), 3)
    # 2) time-block seams (carry) + partial last time block + partial row block.
    check(jax.random.normal(k1, (2, 5, 12800), dtype=jnp.float32), 25,
          time_block=4096)
    # 3) T % 128 != 0 across multiple time blocks; offset % 128 != 0 (no pad path).
    check(jax.random.normal(k2, (3, 1, 3000), dtype=jnp.float32), 9.375,
          time_block=512)
    # 4) offset wider than the time block (carry spans more than one block).
    check(jax.random.normal(k3, (2, 2, 1024), dtype=jnp.float32), 12.5,
          time_block=128)
    # 5) T % 128 != 0 handled as one full-width block (no wrapper pad / slice).
    check(jax.random.normal(k4, (2, 4, 1000), dtype=jnp.float32), 3)
    # 6) bfloat16: dtype-aware sublane quantum (16-row packing).
    check(jax.random.normal(k5, (2, 20, 2048)).astype(jnp.bfloat16), 10)

    print("KERNEL_OK")
</pallas_src>

<mosaic_0001>
module attributes {stable_mosaic.version = 11 : i64} {
  func.func @_delay_kernel(%arg0: i32, %arg1: i32, %arg2: memref<8x1024xf32, #tpu.memory_space<vmem>>, %arg3: memref<8x1024xf32, #tpu.memory_space<vmem>>, %arg4: memref<8x128xf32, #tpu.memory_space<vmem>>) attributes {dimension_semantics = [#tpu.dimension_semantics<parallel>, #tpu.dimension_semantics<arbitrary>], iteration_bounds = array<i64: 1, 1>, scalar_prefetch = 0 : i64, scratch_operands = 1 : i64, tpu.core_type = #tpu.core_type<tc>, window_params = [{transform_indices = @transform_0, window_bounds = array<i64: 8, 1024>}, {transform_indices = @transform_1, window_bounds = array<i64: 8, 1024>}]} {
    %c0 = arith.constant 0 : index
    %c0_0 = arith.constant 0 : index
    %0 = vector.load %arg2[%c0, %c0_0] : memref<8x1024xf32, #tpu.memory_space<vmem>>, vector<8x1024xf32>
    %c0_i32 = arith.constant 0 : i32
    %1 = arith.cmpi eq, %arg1, %c0_i32 : i32
    %2 = arith.extui %1 : i1 to i32
    %c0_i32_1 = arith.constant 0 : i32
    %3 = arith.cmpi ne, %2, %c0_i32_1 : i32
    scf.if %3 {
      %cst_8 = arith.constant 0.000000e+00 : f32
      %13 = vector.broadcast %cst_8 : f32 to vector<8x128xf32>
      %c0_9 = arith.constant 0 : index
      %c0_10 = arith.constant 0 : index
      %14 = vector.load %arg4[%c0_9, %c0_10] : memref<8x128xf32, #tpu.memory_space<vmem>>, vector<8x128xf32>
      tpu.vector_store %arg4[%c0_9, %c0_10], %13 {strides = array<i32>} : memref<8x128xf32, #tpu.memory_space<vmem>>, vector<8x128xf32>,
    } else {
    }
    %c0_2 = arith.constant 0 : index
    %c0_3 = arith.constant 0 : index
    %4 = vector.load %arg4[%c0_2, %c0_3] : memref<8x128xf32, #tpu.memory_space<vmem>>, vector<8x128xf32>
    %5 = tpu.concatenate %4, %0 in 1 : vector<8x128xf32>, vector<8x1024xf32> -> vector<8x1152xf32>
    %6 = vector.extract_strided_slice %5 {offsets = [0, 80], sizes = [8, 1024], strides = [1, 1]} : vector<8x1152xf32> to vector<8x1024xf32>
    %cst = arith.constant 5.000000e-01 : f32
    %7 = vector.broadcast %cst : f32 to vector<8x1024xf32>
    %8 = arith.mulf %7, %6 : vector<8x1024xf32>
    %9 = arith.addf %0, %8 : vector<8x1024xf32>
    %c0_4 = arith.constant 0 : index
    %c0_5 = arith.constant 0 : index
    %10 = vector.load %arg3[%c0_4, %c0_5] : memref<8x1024xf32, #tpu.memory_space<vmem>>, vector<8x1024xf32>
    tpu.vector_store %arg3[%c0_4, %c0_5], %9 {strides = array<i32>} : memref<8x1024xf32, #tpu.memory_space<vmem>>, vector<8x1024xf32>,
    %11 = vector.extract_strided_slice %5 {offsets = [0, 1024], sizes = [8, 128], strides = [1, 1]} : vector<8x1152xf32> to vector<8x128xf32>
    %c0_6 = arith.constant 0 : index
    %c0_7 = arith.constant 0 : index
    %12 = vector.load %arg4[%c0_6, %c0_7] : memref<8x128xf32, #tpu.memory_space<vmem>>, vector<8x128xf32>
    tpu.vector_store %arg4[%c0_6, %c0_7], %11 {strides = array<i32>} : memref<8x128xf32, #tpu.memory_space<vmem>>, vector<8x128xf32>,
    return
  }
  func.func @transform_0(%arg0: i32, %arg1: i32) -> (i32, i32) {
    %c0_i32 = arith.constant 0 : i32
    return %arg0, %arg1 : i32, i32
  }
  func.func @transform_1(%arg0: i32, %arg1: i32) -> (i32, i32) {
    %c0_i32 = arith.constant 0 : i32
    return %arg0, %arg1 : i32, i32
  }
}

</mosaic_0001>

<bundles_post_ra>
// kernel: tpu_custom_call.1
= control target key start
LH: loop header
LB: loop body
LE: loop exit
PB: predicated region body
PF: predicated region fallthrough
CT: control target
= control target key end

     0   :  { %6 = vsyncpa [#allocation4], 0  ;;  %s218_s0 = inlined_call_operand.hbm [shape: f32[8,1024], index: 0, kind: input, shape index: {}]   ;;  %s219_s1 = inlined_call_operand.hbm [shape: f32[8,1024], index: 1, kind: output, shape index: {}]  }
   0x1   :  { %7 = vsyncpa [#allocation5], 0  ;;  %s172_s6 = smov [#allocation3]   ;;  %s124_s10 = scalar_lea.hbm %s218_s0, 1024 }
   0x2   :  { %s14_s7 = sshll.u32 %s172_s6, 4  ;;  %p125_p0 = scmp.ne.s32.totalorder %s218_s0, %s124_s10  ;;  %s15_s7 = int_to_ptr.vmem [resolvable:$true] %s14_s7 }
   0x3   :  { %p128_p1 = scmp.lt.u32.totalorder %s124_s10, %s218_s0 }
   0x5   :  { %p130_p2 = pnand %p128_p1, %p125_p0 }
   0x7   :  { %133 = shalt.err (!%p130_p2)
}
   0x8   :  { %s134_s15 = scalar_lea.vmem %s15_s7, 1024  ;;  %p139_p4 = scmp.lt.s32.totalorder %s15_s7, %s15_s7 }
   0x9   :  { %p135_p3 = scmp.ne.s32.totalorder %s15_s7, %s134_s15  ;;  %p140_p5 = scmp.lt.s32.totalorder %s134_s15, %s134_s15 }
   0xb   :  { %p141_p6 = por %p140_p5, %p139_p4 }
   0xd   :  { %p142_p7 = pnand %p141_p6, %p135_p3 }
   0xf   :  { %145 = shalt.err (!%p142_p7)
}
  0x10   :  { %17 = dma.hbm_to_vmem [thread:$0]  %s218_s0, 1024, %s15_s7, [#allocation4]  }
  0x11   :  { %168 = dma.done.wait [#allocation4], 1024  }
  0x12   :  { %169 = vsyncadd [#allocation4], 4294966272  ;;  %v173_v0 = vmov 0.0   ;;  %s174_s18 = smov 48   ;;  %v22_v1 = vld [vmem:[#allocation3 + $0x8] sm:$0xff]  ;;  %v21_v2 = vld [vmem:[#allocation3] sm:$0xff] }
  0x13   :  { %53 = vrot.lane.b32.xlu0 %v173_v0, %s174_s18  ;;  %v23_v3 = vld [vmem:[#allocation3 + $0x10] sm:$0xff]  ;;  %v37_v4 = vmul.f32 0.5, %v22_v1  ;;  %v36_v5 = vmul.f32 0.5, %v21_v2  ;;  %v24_v6 = vld [vmem:[#allocation3 + $0x18] sm:$0xff]  ;;  %v25_v9 = vld [vmem:[#allocation3 + $0x20] sm:$0xff]  ;;  %vm71_vm0 = vcmask 392192  }
  0x14   :  { %v38_v7 = vmul.f32 0.5, %v23_v3  ;;  %v39_v8 = vmul.f32 0.5, %v24_v6  ;;  %v26_v10 = vld [vmem:[#allocation3 + $0x28] sm:$0xff]  ;;  %v40_v11 = vmul.f32 0.5, %v25_v9  ;;  %v27_v13 = vld [vmem:[#allocation3 + $0x30] sm:$0xff]  ;;  %v28_v14 = vld [vmem:[#allocation3 + $0x38] sm:$0xff] }
  0x15   :  { %57 = vrot.lane.b32.xlu1 %v37_v4, %s174_s18  ;;  %v41_v12 = vmul.f32 0.5, %v26_v10  ;;  %v42_v15 = vmul.f32 0.5, %v27_v13  ;;  %v43_v16 = vmul.f32 0.5, %v28_v14  ;;  %s175_s0 = smov [#allocation6]  }
  0x16   :  { %s111_s19 = sshll.u32 %s175_s0, 4  ;;  %s112_s19 = int_to_ptr.vmem [resolvable:$true] %s111_s19 }
  0x17   :  { %55 = vrot.lane.b32.xlu0 %v36_v5, %s174_s18  ;;  %s146_s20 = scalar_lea.vmem %s112_s19, 1024  ;;  %p151_p9 = scmp.lt.s32.totalorder %s112_s19, %s112_s19 }
  0x18   :  { %p147_p8 = scmp.ne.s32.totalorder %s112_s19, %s146_s20  ;;  %p152_p10 = scmp.lt.s32.totalorder %s146_s20, %s146_s20 }
  0x19   :  { %59 = vrot.lane.b32.xlu1 %v38_v7, %s174_s18 }
  0x1a   :  { %p153_p11 = por %p152_p10, %p151_p9 }
  0x1b   :  { %61 = vrot.lane.b32.xlu0 %v39_v8, %s174_s18 }
  0x1c   :  { %p154_p12 = pnand %p153_p11, %p147_p8 }
  0x1d   :  { %63 = vrot.lane.b32.xlu1 %v40_v11, %s174_s18 }
  0x1f   :  { %65 = vrot.lane.b32.xlu0 %v41_v12, %s174_s18 }
  0x21   :  { %67 = vrot.lane.b32.xlu1 %v42_v15, %s174_s18 }
  0x23   :  { %69 = vrot.lane.b32.xlu0 %v43_v16, %s174_s18 }
  0x85   :  { %v54_v17 = vpop.permute.xlu0 %53 }
  0x87   :  { %v58_v18 = vpop.permute.xlu1 %57 }
  0x89   :  { %v56_v19 = vpop.permute.xlu0 %55 }
  0x8a   :  { %v72_v20 = vsel %vm71_vm0, %v54_v17, %v56_v19  ;;  %v73_v21 = vsel %vm71_vm0, %v56_v19, %v58_v18 }
  0x8b   :  { %v88_v22 = vadd.f32 %v72_v20, %v21_v2  ;;  %v89_v23 = vadd.f32 %v73_v21, %v22_v1  ;;  %v60_v24 = vpop.permute.xlu1 %59 }
  0x8c   :  { %v74_v26 = vsel %vm71_vm0, %v58_v18, %v60_v24 }
  0x8d   :  { %96 = vst [vmem:[#allocation6] sm:$0xff] %v88_v22  ;;  %97 = vst [vmem:[#allocation6 + $0x8] sm:$0xff] %v89_v23  ;;  %v62_v25 = vpop.permute.xlu0 %61  ;;  %v90_v28 = vadd.f32 %v74_v26, %v23_v3 }
  0x8e   :  { %v75_v27 = vsel %vm71_vm0, %v60_v24, %v62_v25 }
  0x8f   :  { %v91_v29 = vadd.f32 %v75_v27, %v24_v6  ;;  %98 = vst [vmem:[#allocation6 + $0x10] sm:$0xff] %v90_v28  ;;  %v64_v30 = vpop.permute.xlu1 %63 }
  0x90   :  { %v76_v32 = vsel %vm71_vm0, %v62_v25, %v64_v30 }
  0x91   :  { %99 = vst [vmem:[#allocation6 + $0x18] sm:$0xff] %v91_v29  ;;  %v66_v31 = vpop.permute.xlu0 %65  ;;  %v92_v34 = vadd.f32 %v76_v32, %v25_v9 }
  0x92   :  { %v77_v33 = vsel %vm71_vm0, %v64_v30, %v66_v31 }
  0x93   :  { %v93_v35 = vadd.f32 %v77_v33, %v26_v10  ;;  %100 = vst [vmem:[#allocation6 + $0x20] sm:$0xff] %v92_v34  ;;  %v68_v36 = vpop.permute.xlu1 %67 }
  0x94   :  { %v78_v38 = vsel %vm71_vm0, %v66_v31, %v68_v36 }
  0x95   :  { %101 = vst [vmem:[#allocation6 + $0x28] sm:$0xff] %v93_v35  ;;  %v70_v37 = vpop.permute.xlu0 %69  ;;  %v94_v40 = vadd.f32 %v78_v38, %v27_v13 }
  0x96   :  { %v79_v39 = vsel %vm71_vm0, %v68_v36, %v70_v37 }
  0x97   :  { %v95_v41 = vadd.f32 %v79_v39, %v28_v14  ;;  %102 = vst [vmem:[#allocation6 + $0x30] sm:$0xff] %v94_v40 }
  0x99   :  { %103 = vst [vmem:[#allocation6 + $0x38] sm:$0xff] %v95_v41 }
  0x9a   :  { %157 = shalt.err (!%p154_p12)
}
  0x9b   :  { %s158_s23 = scalar_lea.hbm %s219_s1, 1024 }
  0x9c   :  { %p159_p13 = scmp.ne.s32.totalorder %s219_s1, %s158_s23  ;;  %p162_p0 = scmp.lt.u32.totalorder %s158_s23, %s219_s1 }
  0x9e   :  { %p164_p1 = pnand %p162_p0, %p159_p13 }
  0xa0   :  { %167 = shalt.err (!%p164_p1)
}
  0xa1   :  { %114 = dma.vmem_to_hbm [thread:$0]  %s112_s19, 1024, %s219_s1, [#allocation5]  }
  0xa2   :  { %170 = dma.done.wait [#allocation5], 1024  }
  0xa3   :  { %171 = vsyncadd [#allocation5], 4294966272 }
  0xa4   :  { %118 = vsyncpa [#allocation4], 1 }
  0xa5   :  { %119 = vsyncpa [#allocation5], 1 }

</bundles_post_ra>
